<compile_context>
chip_gen: v7x
topology: tpu7x:2x2x1
jax: 0.10.0
libtpu: 0.0.40
codegen_flags: <defaults>
</compile_context>

<pallas_src>
import functools

import jax
import jax.numpy as jnp
from jax import lax
from jax.experimental import pallas as pl
from jax.experimental.pallas import tpu as pltpu


def _fused_matmul_bias_lrelu_kernel(w_ref, p_ref, b_ref, o_ref, *, slope):
    # w_ref: (Cout, K)      bf16   -- flattened conv weight (resident)
    # p_ref: (K, tile_m)    bf16   -- im2col patch tile (lane-dense M)
    # b_ref: (Cout, 1)      f32    -- bias (broadcast along lanes, resident)
    # o_ref: (Cout, tile_m) f32    -- lane-dense output tile
    acc = jnp.dot(w_ref[...], p_ref[...], preferred_element_type=jnp.float32)
    y = acc + b_ref[...]
    o_ref[...] = jnp.where(y > 0, y, slope * y).astype(o_ref.dtype)


def _pick_tile_m(m_pad, k):
    # Largest lane-multiple tile dividing m_pad, preferring >= 2 grid steps
    # (pipelining + work for both v7x TensorCores).
    candidates = [t for t in (2048, 1024, 512, 256, 128) if m_pad % t == 0]
    if not candidates:
        return m_pad
    multi = [t for t in candidates if m_pad // t >= 2]
    tile_m = multi[0] if multi else candidates[0]
    # VMEM guard: double-buffered bf16 patch tile should stay well under budget.
    while tile_m > 128 and (k * tile_m * 2 * 2) > (8 << 20) and m_pad % (tile_m // 2) == 0:
        tile_m //= 2
    return tile_m


def conv_with_activation_pallas(x_nchw, w_oihw, bias, *, stride=1, padding=1,
                                dilation=1, slope=0.2):
    """Forward of ConvWithActivation (weight assumed already spectral-normalized)."""
    N, Cin, H, W = x_nchw.shape
    Cout, Cin_w, KH, KW = w_oihw.shape
    assert Cin == Cin_w
    # TODO(synk): groups != 1 not implemented (module default groups=1 used).

    Ho = (H + 2 * padding - dilation * (KH - 1) - 1) // stride + 1
    Wo = (W + 2 * padding - dilation * (KW - 1) - 1) // stride + 1

    M = N * Ho * Wo
    K = Cin * KH * KW

    # ---- glue: pad + im2col directly in (K, M) layout, K ordered (cin, kh, kw)
    # to match w_oihw.reshape(Cout, -1) — no weight transpose needed.
    x_pad = jnp.pad(x_nchw, ((0, 0), (0, 0),
                             (padding, padding), (padding, padding)))
    taps = []
    for kh in range(KH):
        for kw in range(KW):
            h0, w0 = kh * dilation, kw * dilation
            taps.append(x_pad[:, :, h0:h0 + (Ho - 1) * stride + 1:stride,
                                    w0:w0 + (Wo - 1) * stride + 1:stride])
    # (N, Cin, KH*KW, Ho, Wo) -> (Cin, KH*KW, N, Ho, Wo) -> (K, M)
    patches_t = jnp.transpose(jnp.stack(taps, axis=2),
                              (1, 2, 0, 3, 4)).reshape(K, M)
    patches_t = patches_t.astype(jnp.bfloat16)

    w_t = w_oihw.reshape(Cout, K).astype(jnp.bfloat16)     # (Cout, K)
    b2 = bias.reshape(Cout, 1).astype(jnp.float32)

    # Pad M up to a lane multiple so output stores are unmasked.
    M_pad = ((M + 127) // 128) * 128
    if M_pad != M:
        patches_t = jnp.pad(patches_t, ((0, 0), (0, M_pad - M)))

    tile_m = _pick_tile_m(M_pad, K)
    grid = (M_pad // tile_m,)

    kernel = functools.partial(_fused_matmul_bias_lrelu_kernel, slope=slope)

    out_t = pl.pallas_call(
        kernel,
        out_shape=jax.ShapeDtypeStruct((Cout, M_pad), x_nchw.dtype),
        grid=grid,
        in_specs=[
            pl.BlockSpec((Cout, K), lambda i: (0, 0)),        # weight (resident)
            pl.BlockSpec((K, tile_m), lambda i: (0, i)),      # patch tile
            pl.BlockSpec((Cout, 1), lambda i: (0, 0)),        # bias (resident)
        ],
        out_specs=pl.BlockSpec((Cout, tile_m), lambda i: (0, i)),
        compiler_params=pltpu.CompilerParams(dimension_semantics=("parallel",)),
    )(w_t, patches_t, b2)

    # ---- glue: (Cout, M) -> NCHW ----------------------------------------------
    out_t = out_t[:, :M]
    return jnp.transpose(out_t.reshape(Cout, N, Ho, Wo), (1, 0, 2, 3))


def kaiming_normal(key, shape):
    # nn.init.kaiming_normal_ defaults: fan_in mode, gain = sqrt(2).
    cout, cin, kh, kw = shape
    fan_in = cin * kh * kw
    std = jnp.sqrt(2.0 / fan_in)
    return std * jax.random.normal(key, shape, jnp.float32)


def spectral_normalize(w_oihw, key, n_power_iterations=1, eps=1e-12):
    # Emulates torch.nn.utils.spectral_norm: w / sigma, sigma = u^T W v, one
    # deterministic power iteration (u initialized from PRNG).
    # TODO(synk): not bit-identical to torch's persistent u/v buffers; glue only.
    cout = w_oihw.shape[0]
    w_mat = w_oihw.reshape(cout, -1)
    u = jax.random.normal(key, (cout,), jnp.float32)
    u = u / (jnp.linalg.norm(u) + eps)
    v = u
    for _ in range(n_power_iterations):
        v = w_mat.T @ u
        v = v / (jnp.linalg.norm(v) + eps)
        u = w_mat @ v
        u = u / (jnp.linalg.norm(u) + eps)
    sigma = u @ (w_mat @ v)
    return w_oihw / sigma


if __name__ == "__main__":
    # Small shapes consistent with the module: Conv2d(4, 8, k=3, stride=1, padding=1).
    N, Cin, H, W = 2, 4, 16, 16
    Cout, KH, KW = 8, 3, 3
    stride, padding = 1, 1

    key = jax.random.PRNGKey(0)
    kx, kw_, ku, kb = jax.random.split(key, 4)

    x = jax.random.normal(kx, (N, Cin, H, W), jnp.float32)
    w_raw = kaiming_normal(kw_, (Cout, Cin, KH, KW))
    bias = 0.1 * jax.random.normal(kb, (Cout,), jnp.float32)

    w_sn = spectral_normalize(w_raw, ku)

    out = conv_with_activation_pallas(x, w_sn, bias, stride=stride, padding=padding)
    out = jax.block_until_ready(out)

    # Pure-JAX reference.  The kernel uses bf16 MXU operands (f32 accumulation),
    # so compare against an f32 conv of the same bf16-rounded inputs.
    xb = x.astype(jnp.bfloat16).astype(jnp.float32)
    wb = w_sn.astype(jnp.bfloat16).astype(jnp.float32)
    ref = lax.conv_general_dilated(
        xb, wb, window_strides=(stride, stride),
        padding=((padding, padding), (padding, padding)),
        dimension_numbers=("NCHW", "OIHW", "NCHW"))
    ref = ref + bias.reshape(1, Cout, 1, 1)
    ref = jnp.where(ref > 0, ref, 0.2 * ref)

    assert out.shape == (N, Cout, H, W)
    assert jnp.allclose(out, ref, atol=5e-3, rtol=5e-3)
    print("KERNEL_OK")
</pallas_src>

<mosaic_0001>
module attributes {stable_mosaic.version = 11 : i64} {
  func.func @_fused_matmul_bias_lrelu_kernel(%arg0: i32, %arg1: memref<8x36xbf16, #tpu.memory_space<vmem>>, %arg2: memref<36x256xbf16, #tpu.memory_space<vmem>>, %arg3: memref<8x1xf32, #tpu.memory_space<vmem>>, %arg4: memref<8x256xf32, #tpu.memory_space<vmem>>) attributes {dimension_semantics = [#tpu.dimension_semantics<parallel>], iteration_bounds = array<i64: 2>, scalar_prefetch = 0 : i64, scratch_operands = 0 : i64, tpu.core_type = #tpu.core_type<tc>, window_params = [{pipeline_mode = #tpu.pipeline_mode<synchronous>, transform_indices = @transform_0, window_bounds = array<i64: 8, 36>}, {transform_indices = @transform_1, window_bounds = array<i64: 36, 256>}, {pipeline_mode = #tpu.pipeline_mode<synchronous>, transform_indices = @transform_2, window_bounds = array<i64: 8, 1>}, {transform_indices = @transform_3, window_bounds = array<i64: 8, 256>}]} {
    %c0 = arith.constant 0 : index
    %c0_0 = arith.constant 0 : index
    %0 = vector.load %arg1[%c0, %c0_0] : memref<8x36xbf16, #tpu.memory_space<vmem>>, vector<8x36xbf16>
    %c0_1 = arith.constant 0 : index
    %c0_2 = arith.constant 0 : index
    %1 = vector.load %arg2[%c0_1, %c0_2] : memref<36x256xbf16, #tpu.memory_space<vmem>>, vector<36x256xbf16>
    %cst = arith.constant dense<0.000000e+00> : vector<8x256xf32>
    %2 = tpu.matmul %0, %1, %cst {dimension_numbers = #tpu.dot_dimension_numbers<[1], [0], [0], [1], [0, 0, 1, 1], [], []>} : vector<8x36xbf16>, vector<36x256xbf16>, vector<8x256xf32> -> vector<8x256xf32>
    %c0_3 = arith.constant 0 : index
    %c0_4 = arith.constant 0 : index
    %3 = vector.load %arg3[%c0_3, %c0_4] : memref<8x1xf32, #tpu.memory_space<vmem>>, vector<8x1xf32>
    %4 = vector.broadcast %3 : vector<8x1xf32> to vector<8x256xf32>
    %5 = arith.addf %2, %4 : vector<8x256xf32>
    %cst_5 = arith.constant 0.000000e+00 : f32
    %6 = vector.broadcast %cst_5 : f32 to vector<8x256xf32>
    %7 = arith.cmpf ogt, %5, %6 : vector<8x256xf32>
    %cst_6 = arith.constant 2.000000e-01 : f32
    %8 = vector.broadcast %cst_6 : f32 to vector<8x256xf32>
    %9 = arith.mulf %8, %5 : vector<8x256xf32>
    %10 = arith.select %7, %5, %9 : vector<8x256xi1>, vector<8x256xf32>
    %c0_7 = arith.constant 0 : index
    %c0_8 = arith.constant 0 : index
    %11 = vector.load %arg4[%c0_7, %c0_8] : memref<8x256xf32, #tpu.memory_space<vmem>>, vector<8x256xf32>
    tpu.vector_store %arg4[%c0_7, %c0_8], %10 {strides = array<i32>} : memref<8x256xf32, #tpu.memory_space<vmem>>, vector<8x256xf32>,
    return
  }
  func.func @transform_0(%arg0: i32) -> (i32, i32) {
    %c0_i32 = arith.constant 0 : i32
    %c0_i32_0 = arith.constant 0 : i32
    %c0_i32_1 = arith.constant 0 : i32
    return %c0_i32, %c0_i32_0 : i32, i32
  }
  func.func @transform_1(%arg0: i32) -> (i32, i32) {
    %c0_i32 = arith.constant 0 : i32
    %c0_i32_0 = arith.constant 0 : i32
    return %c0_i32, %arg0 : i32, i32
  }
  func.func @transform_2(%arg0: i32) -> (i32, i32) {
    %c0_i32 = arith.constant 0 : i32
    %c0_i32_0 = arith.constant 0 : i32
    %c0_i32_1 = arith.constant 0 : i32
    return %c0_i32, %c0_i32_0 : i32, i32
  }
  func.func @transform_3(%arg0: i32) -> (i32, i32) {
    %c0_i32 = arith.constant 0 : i32
    %c0_i32_0 = arith.constant 0 : i32
    return %c0_i32, %arg0 : i32, i32
  }
}

</mosaic_0001>

<bundles_post_ra>
// kernel: tpu_custom_call.1
= control target key start
LH: loop header
LB: loop body
LE: loop exit
PB: predicated region body
PF: predicated region fallthrough
CT: control target
= control target key end

     0   :  { %8 = vsyncpa [#allocation3], 0  ;;  %s744_s0 = inlined_call_operand.vmem [shape: bf16[8,36], index: 0, kind: input, shape index: {}]   ;;  %s745_s1 = inlined_call_operand.hbm [shape: bf16[36,512], index: 1, kind: input, shape index: {}]   ;;  %s746_s2 = inlined_call_operand.vmem [shape: f32[8,1], index: 2, kind: input, shape index: {}]   ;;  %s747_s3 = inlined_call_operand.hbm [shape: f32[8,512], index: 3, kind: output, shape index: {}]  }
   0x1   :  { %10 = vsyncpa [#allocation3 + $0x1], 0 }
   0x2   :  { %11 = vsyncpa [#allocation4], 0 }
   0x3   :  { %13 = vsyncpa [#allocation4 + $0x1], 0  ;;  %s581_s12 = smov 0   ;;  %s583_s13 = smov 0  }
   0x4   :  { %s585_s14 = smov 0   ;;  %s587_s15 = smov 0  }
   0x5 LB: > { %s602_s16 = sadd.s32 4294967295, %s553_s15   ;;  %s374_s17 = sadd.s32 4294967294, %s553_s15   ;;  %s553_s15 = sphi %s587_s15, %s760_s15   ;;  %s549_s14 = sphi %s585_s14, %s759_s14   ;;  %s545_s13 = sphi %s583_s13, %s758_s13   ;;  %s541_s12 = sphi %s581_s12, %s757_s12  }
   0x6   : > { %s606_s18 = sadd.s32 1, %s553_s15   ;;  %s47_s19 = sadd.s32 1, %s549_s14 }
   0x7   : > { %s44_s20 = ssub.s32 %s553_s15, %s606_s18  ;;  %p54_p0 = scmp.ne.s32.totalorder %s549_s14, %s545_s13 }
   0x8   : > { %p45_p1 = scmp.eq.s32.totalorder %s44_s20, 0  ;;  %p55_p2 = scmp.eq.s32.totalorder %s553_s15, 0 }
   0x9   : > { %p60_p3 = scmp.ne.s32.totalorder %s545_s13, %s541_s12  ;;  %p61_p4 = scmp.eq.s32.totalorder %s602_s16, 0 }
   0xa   : > { %s618_s21 = scalar_select %p45_p1, %s549_s14, %s47_s19  }
   0xb   : > { %p56_p5 = por %p55_p2, %p54_p0  ;;  %p620_p6 = por %p61_p4, %p60_p3 }
   0xc   : > { %p105_p7 = scmp.eq.s32.totalorder %s602_s16, 1  ;;  %p111_p8 = scmp.eq.s32.totalorder %s374_s17, 1 }
   0xd   : > { %p410_p10 = scmp.lt.s32.totalorder %s553_s15, 2  ;;  %s137_s25 = sand.u32 1, %s549_s14  }
   0xe   : > { %p627_p11 = por %p105_p7, %p54_p0  ;;  %p631_p12 = por %p111_p8, %p60_p3 }
   0xf   : > { %s394_s26 = sshll.u32 %s553_s15, 7  ;;  %s396_s27 = smul.u32 40, %s137_s25 }
  0x10   : > { %s750_s23 = scalar_select %p627_p11, 1, 0 }
  0x11   : > { %s751_s24 = scalar_select %p631_p12, 1, 0 }
  0x12   : > { %s640_s30 = scalar_lea.hbm %s745_s1, %s394_s26  ;;  %p642_p13 = pnand %p410_p10, %p56_p5 }
  0x13   : > { %s141_s5 = scalar_lea.vmem [#allocation2], %s396_s27  ;;  %s649_s7 = scalar_lea.sflag [#allocation3], %s137_s25 }
  0x14   : > { %s148_s6 = sshll.u32 %s141_s5, 4  ;;  %s457_s8 = scalar_lea.hbm %s640_s30, 640  ;;  %s646_s6 = int_to_ptr.vmem [resolvable:$true] %s148_s6 }
  0x15   : > { %p458_p1 = scmp.ne.s32.totalorder %s640_s30, %s457_s8  ;;  %p459_p2 = pneg %p642_p13 }
  0x16   : > { %s462_s11 = scalar_lea.hbm %s745_s1, 1280  ;;  %p463_p5 = scmp.lt.u32.totalorder %s640_s30, %s745_s1 }
  0x17   : > { %p460_p3 = pnand %p459_p2, %p458_p1  ;;  %p464_p7 = scmp.lt.u32.totalorder %s462_s11, %s457_s8 }
  0x18   : > { %p466_p10 = scmp.lt.u32.totalorder %s457_s8, %s640_s30 }
  0x19   : > { %p461_p4 = pneg %p460_p3  ;;  %p465_p8 = por %p464_p7, %p463_p5 }
  0x1b   : > { %p467_p9 = por %p466_p10, %p465_p8 }
  0x1d   : > { %p468_p0 = pnand %p467_p9, %p461_p4 }
  0x1f   : > { %471 = shalt.err (!%p468_p0)
}
  0x20   : > { %s472_s20 = scalar_lea.vmem %s646_s6, 640  ;;  %s555_s25 = smov [#allocation2]  }
  0x21   : > { %p473_p1 = scmp.ne.s32.totalorder %s646_s6, %s472_s20  ;;  %s477_s26 = sshll.u32 %s555_s25, 4  ;;  %s478_s26 = int_to_ptr.vmem [resolvable:$false] %s477_s26 }
  0x22   : > { %s479_s27 = scalar_lea.vmem %s478_s26, 1280  ;;  %p480_p11 = scmp.lt.s32.totalorder %s646_s6, %s478_s26 }
  0x23   : > { %p475_p3 = pnand %p473_p1, %p459_p2  ;;  %p481_p5 = scmp.lt.s32.totalorder %s479_s27, %s472_s20 }
  0x25   : > { %p476_p12 = pneg %p475_p3  ;;  %p482_p7 = por %p481_p5, %p480_p11 }
  0x27   : > { %p483_p8 = pnand %p482_p7, %p476_p12 }
  0x29   : > { %486 = shalt.err (!%p483_p8)
}
  0x2a   : > { %s556_s28 = smov 256   ;;  %s557_s29 = smov 128  }
  0x2b   : > { %s558_s5 = smov 8   ;;  %p156_p9 = scmp.lt.s32.totalorder %s553_s15, 3 }
  0x2c   : > { %405 = dma.hbm_to_vmem [thread:$0]  (!%p642_p13), %s640_s30, 640, %s646_s6, %s649_s7, %s556_s28, %s557_s29, %s558_s5  }
  0x2d   : > { %p753_p0 = scmp.ge.s32.totalorder %s553_s15, 1 }
  0x2f   : > { %p157_p2 = pnand %p753_p0, %p156_p9 }
  0x30   : > { %s681_s8 = sand.u32 (!%p157_p2), 1, %s545_s13  }
  0x31   : > { %160 = sbr.rel (%p157_p2) target bundleno = 303 (0x12f), region = 32  ;;  %s163_s10 = scalar_lea.sflag (!%p157_p2), [#allocation3], %s681_s8 }
  0x32   : > { %s397_s9 = smul.u32 (!%p157_p2), 40, %s681_s8 }
  0x34   : > { %s166_s11 = scalar_lea.vmem (!%p157_p2), [#allocation2], %s397_s9 }
  0x38   : > { %532 = dma.done.wait (%p620_p6), %s163_s10, 640  }
  0x39   : > { %534 = vsyncadd (%p620_p6), %s163_s10, 4294966656  ;;  %v559_v0 = vmov 0   ;;  %v449_v1 = vld [vmem:[%s166_s11 + $0x4] ss:$8 sps:$4 sm:$0xff]   ;;  %v451_v2 = vld [vmem:[%s166_s11] ss:$8 sps:$4 sm:$0xff]  }
  0x3a   : > { %272 = vmatprep.mubr.bf16.mxu0 %v559_v0  ;;  %448 = vset.pattern.permute.xlu0 %v559_v0  ;;  %v452_v3 = vld [vmem:[%s166_s11 + $0x14] ss:$8 sps:$4 sm:$0xff]   ;;  %v197_v4 = vld [vmem:[%s166_s11 + $0x20] sm:$0x33]  ;;  %v454_v5 = vld [vmem:[%s166_s11 + $0x10] ss:$8 sps:$4 sm:$0xff]  }
  0x3b   : > { %240 = vmatprep.subr.bf16.mxu0 %v449_v1  ;;  %v198_v6 = vld [vmem:[%s746_s2] sm:$0xff]  ;;  %v386_v7 = vcombine.high %v197_v4, %v197_v4  ;;  %v385_v8 = vcombine.low %v197_v4, %v197_v4  ;;  %vm233_vm0 = vcmask 1041408   ;;  %vm229_vm1 = vcmask 293888   ;;  %s380_s7 = sshll.u32 %s681_s8, 4  ;;  %s395_s17 = sshll.u32 %s602_s16, 8 }
  0x3c   : > { %241 = vmatpush1.bf16.msra.mxu0 %v451_v2  ;;  %201 = vperm.xlu0 %448, %v198_v6   ;;  %v192_v10 = vld [vmem:[%s744_s0] sm:$0xf]  ;;  %s188_s19 = scalar_lea.vmem [#allocation5], %s380_s7  ;;  %s700_s27 = scalar_lea.hbm %s747_s3, %s395_s17 }
  0x3d   : > { %242 = vmatprep.subr.bf16.mxu0 %v452_v3  ;;  %v235_v9 = vsel %vm233_vm0, %v385_v8, 0  ;;  %s304_s20 = sshll.u32 %s188_s19, 4  ;;  %s290_s16 = scalar_lea.sflag [#allocation4], %s681_s8  ;;  %s702_s20 = int_to_ptr.vmem [resolvable:$true] %s304_s20 }
  0x3e   : > { %s487_s28 = scalar_lea.vmem %s702_s20, 256  ;;  %p754_p11 = scmp.ne.s32.totalorder %s750_s23, 0 }
  0x3f   : > { %p488_p6 = scmp.ne.s32.totalorder %s702_s20, %s487_s28  ;;  %s560_s29 = smov [#allocation5]  }
  0x40   : > { %243 = vmatpush1.bf16.msra.mxu0 %v454_v5  ;;  %s491_s5 = sshll.u32 %s560_s29, 4  ;;  %s492_s5 = int_to_ptr.vmem [resolvable:$false] %s491_s5 }
  0x41   : > { %387 = vmatprep.subr.msk.bf16.mxu0 %vm233_vm0, %v386_v7  ;;  %p489_p12 = pnand %p488_p6, %p754_p11  ;;  %s493_s9 = scalar_lea.vmem %s492_s5, 512 }
  0x42   : > { %p494_p4 = scmp.lt.s32.totalorder %s702_s20, %s492_s5  ;;  %p495_p10 = scmp.lt.s32.totalorder %s493_s9, %s487_s28 }
  0x43   : > { %p490_p13 = pneg %p489_p12 }
  0x44   : > { %245 = vmatpush1.bf16.msra.mxu0 %v235_v9  ;;  %p496_p1 = por %p495_p10, %p494_p4 }
  0x46   : > { %p497_p3 = pnand %p496_p1, %p490_p13 }
  0x47   : > { %388 = vmatmul.mubr.msk.bf16.vlgmr.msra.gmra.mrb[0].mxu0 %vm229_vm1, %v192_v10 }
  0xbb   : > { %v202_v11 = vpop.permute.xlu0 %201 }
 0x11a   : > { %v274_v12 = vpop.f32.mrb[0].mxu0 }
 0x11b   : > { %v275_v13 = vadd.f32 %v274_v12, %v202_v11  ;;  %v276_v14 = vpop.f32.mrb[1].mxu0 }
 0x11c   : > { %v277_v15 = vadd.f32 %v276_v14, %v202_v11  ;;  %v278_v16 = vpop.f32.mrb[2].mxu0 }
 0x11d   : > { %vm281_vm2 = vcmp.gt.f32.partialorder %v275_v13, 0.0  ;;  %v283_v17 = vmul.f32 0.2, %v275_v13  ;;  %v279_v18 = vpop.f32.mrb[3].mxu0 }
 0x11e   : > { %vm282_vm3 = vcmp.gt.f32.partialorder %v277_v15, 0.0  ;;  %v284_v19 = vmul.f32 0.2, %v277_v15 }
 0x11f   : > { %v285_v20 = vsel %vm281_vm2, %v275_v13, %v283_v17 }
 0x120   : > { %287 = vst [vmem:[%s188_s19] sm:$0xff] %v285_v20  ;;  %v286_v21 = vsel %vm282_vm3, %v277_v15, %v284_v19 }
 0x121   : > { %288 = vst [vmem:[%s188_s19 + $0x8] sm:$0xff] %v286_v21 }
 0x122   : > { %500 = shalt.err (!%p497_p3)
}
 0x123   : > { %s501_s8 = scalar_lea.hbm %s700_s27, 256  ;;  %s505_s30 = scalar_lea.hbm %s747_s3, 512 }
 0x124   : > { %p502_p5 = scmp.ne.s32.totalorder %s700_s27, %s501_s8  ;;  %p506_p9 = scmp.lt.u32.totalorder %s700_s27, %s747_s3 }
 0x125   : > { %p507_p0 = scmp.lt.u32.totalorder %s505_s30, %s501_s8  ;;  %p509_p6 = scmp.lt.u32.totalorder %s501_s8, %s700_s27 }
 0x126   : > { %p503_p7 = pnand %p502_p5, %p754_p11 }
 0x127   : > { %p508_p2 = por %p507_p0, %p506_p9 }
 0x128   : > { %p504_p8 = pneg %p503_p7 }
 0x129   : > { %p510_p12 = por %p509_p6, %p508_p2 }
 0x12b   : > { %p511_p13 = pnand %p510_p12, %p504_p8 }
 0x12d   : > { %514 = shalt.err (!%p511_p13)
}
 0x12e   : > { %400 = dma.vmem_to_hbm [thread:$0]  (%p754_p11), %s702_s20, 256, %s700_s27, %s290_s16  }
 0x12f PF: > { %s316_s6 = sand.u32 1, %s541_s12   ;;  %p755_p4 = scmp.ne.s32.totalorder %s751_s24, 0 }
 0x130   : > { %p756_p10 = scmp.ge.s32.totalorder %s553_s15, 2  ;;  %s317_s7 = scalar_lea.sflag [#allocation4], %s316_s6 }
 0x132   : > { %p407_p1 = pnand %p756_p10, %p755_p4 }
 0x134   : > { %536 = dma.done.wait (!%p407_p1), %s317_s7, 256  }
 0x135   : > { %538 = vsyncadd (!%p407_p1), %s317_s7, 4294967040  ;;  %p16_p3 = scmp.ge.s32.totalorder %s606_s18, 4   ;;  %s757_s12 = smov %s545_s13 }
 0x136   : > { %s758_s13 = smov %s549_s14  ;;  %s759_s14 = smov %s618_s21 }
 0x137   : > { %s760_s15 = smov %s606_s18  ;;  %18 = sbr.rel (!%p16_p3) target bundleno = 5 (0x5), region = 77 }
 0x13e   :  { %322 = vsyncpa [#allocation3], 1 }
 0x13f   :  { %324 = vsyncpa [#allocation3 + $0x1], 1 }
 0x140   :  { %325 = vsyncpa [#allocation4], 1 }
 0x141   :  { %327 = vsyncpa [#allocation4 + $0x1], 1 }

</bundles_post_ra>
